<compile_context>
chip_gen: v7x
topology: tpu7x:2x2x1
jax: 0.10.0
libtpu: 0.0.40
codegen_flags: <defaults>
</compile_context>

<pallas_src>
import functools
import math

import jax
import jax.numpy as jnp
from jax.experimental import pallas as pl
from jax.experimental.pallas import tpu as pltpu


def _round_up(n, m):
    return ((n + m - 1) // m) * m


@functools.lru_cache(maxsize=None)
def _vmem_capacity_bytes():
    try:
        return int(pltpu.get_tpu_info().vmem_capacity_bytes)
    except Exception:
        return 64 * 1024 * 1024  # conservative default (v7x per-TensorCore)


def _interp_kernel(x_ref, y_ref):
    """One grid step: (tb, nx, ny) cell block -> (tb, nx+1, ny+1) vertices."""
    xf = x_ref[...].astype(jnp.float32)                    # (tb, nx, ny)

    # ---- Row (sublane) pass: s[i] = x[max(i-1,0)] + x[min(i,nx-1)], i=0..nx
    x_lo = jnp.concatenate([xf[:, :1, :], xf], axis=1)      # x[max(i-1,0)]
    x_hi = jnp.concatenate([xf, xf[:, -1:, :]], axis=1)     # x[min(i,nx-1)]
    s = x_lo + x_hi                                          # (tb, nx+1, ny)

    # ---- Column (lane) pass: y[j] = 0.25*(s[max(j-1,0)] + s[min(j,ny-1)])
    s_lo = jnp.concatenate([s[:, :, :1], s], axis=2)         # (tb, nx+1, ny+1)
    s_hi = jnp.concatenate([s, s[:, :, -1:]], axis=2)

    # Single full-block store; masked vst only on the final partial lane tile.
    y_ref[...] = (0.25 * (s_lo + s_hi)).astype(y_ref.dtype)


def _choose_tiling(b, nx, ny, in_itemsize):
    """Pick batch-slices-per-step (tb) and vmem_limit_bytes, per generation."""
    cap = _vmem_capacity_bytes()
    if cap <= 72 * 1024 * 1024:          # v7x-class: 64 MiB per TensorCore
        step_budget = 20 * 1024 * 1024
        vmem_limit = 40 * 1024 * 1024
    else:                                # v5e / v6e: 128 MiB
        step_budget = 56 * 1024 * 1024
        vmem_limit = 100 * 1024 * 1024

    # VMEM-tiled footprint of one batch slice (lane/sublane padded).
    sub_in = max(8, 32 // max(1, in_itemsize))   # sublane packing of input dtype
    in_tile = _round_up(nx, sub_in) * _round_up(ny, 128) * in_itemsize
    out_tile = _round_up(nx + 1, 8) * _round_up(ny + 1, 128) * 4
    per_slice = (
        2 * in_tile        # double-buffered input block
        + 2 * out_tile     # double-buffered output block
        + 5 * out_tile     # in-kernel f32 temporaries (estimate)
    )

    tb = max(1, step_budget // per_slice)
    tb = min(tb, b)

    # Keep >= ~TARGET_STEPS grid steps when the batch allows, so each
    # TensorCore gets several pipelined steps (v7x splits the grid across 2).
    TARGET_STEPS = 8
    if b > 1:
        tb = min(tb, max(1, b // min(b, TARGET_STEPS)))

    # Safety: if even a single slice exceeds the step budget, raise the limit
    # toward capacity (leaving headroom) rather than failing to compile.
    if per_slice > step_budget:
        vmem_limit = max(vmem_limit,
                         min(cap - 16 * 1024 * 1024, per_slice * 3 // 2))

    return tb, int(vmem_limit)


@jax.jit
def volume_to_vertex_interpolate_2d(x):
    """Pallas TPU forward pass of VolumeToVertexInterpolator2d."""
    lead = x.shape[:-2]
    nx, ny = x.shape[-2], x.shape[-1]
    b = math.prod(lead) if lead else 1

    xb = x.reshape((b, nx, ny))        # leading-dim merge: free metadata reshape
    tb, vmem_limit = _choose_tiling(b, nx, ny, jnp.dtype(x.dtype).itemsize)
    grid = (pl.cdiv(b, tb),)

    # TODO(synk): add spatial (nx/ny) tiling with a one-cell halo for single
    # slices too large for the VMEM budget; current blocks span full nx, ny.
    # TODO(synk): if an xprof trace shows exposed input DMA at step
    # boundaries, add pipeline_mode=pl.Buffered(3) on the input BlockSpec.

    out = pl.pallas_call(
        _interp_kernel,
        out_shape=jax.ShapeDtypeStruct((b, nx + 1, ny + 1), jnp.float32),
        grid=grid,
        in_specs=[pl.BlockSpec((tb, nx, ny), lambda i: (i, 0, 0))],
        out_specs=pl.BlockSpec((tb, nx + 1, ny + 1), lambda i: (i, 0, 0)),
        compiler_params=pltpu.CompilerParams(
            dimension_semantics=("parallel",),
            vmem_limit_bytes=vmem_limit,
        ),
    )(xb)

    return out.reshape(lead + (nx + 1, ny + 1))   # free metadata reshape


def _reference(x):
    """Pure-JAX reference mirroring the PyTorch forward()."""
    xf = x.astype(jnp.float32)
    pad = [(0, 0)] * (xf.ndim - 2) + [(1, 1), (1, 1)]
    xp = jnp.pad(xf, pad, mode="edge")
    return 0.25 * (xp[..., :-1, :-1] + xp[..., 1:, :-1]
                   + xp[..., :-1, 1:] + xp[..., 1:, 1:])


if __name__ == "__main__":
    key = jax.random.PRNGKey(0)
    # Module has no parameters; only the input is needed.
    x = jax.random.normal(key, (2, 4, 16, 16), dtype=jnp.float32)

    y = jax.block_until_ready(volume_to_vertex_interpolate_2d(x))
    y_ref = _reference(x)
    assert y.shape == (2, 4, 17, 17), y.shape
    assert y.dtype == jnp.float32
    assert jnp.allclose(y, y_ref, atol=1e-6, rtol=1e-6)

    # Ragged / odd-size check: odd batch, non-(8,128)-aligned spatial dims.
    x2 = jax.random.normal(jax.random.PRNGKey(1), (5, 33, 47), dtype=jnp.float32)
    y2 = jax.block_until_ready(volume_to_vertex_interpolate_2d(x2))
    assert y2.shape == (5, 34, 48), y2.shape
    assert jnp.allclose(y2, _reference(x2), atol=1e-6, rtol=1e-6)

    print("KERNEL_OK")
</pallas_src>

<mosaic_0001>
module attributes {stable_mosaic.version = 11 : i64} {
  func.func @_interp_kernel(%arg0: i32, %arg1: memref<1x16x16xf32, #tpu.memory_space<vmem>>, %arg2: memref<1x17x17xf32, #tpu.memory_space<vmem>>) attributes {dimension_semantics = [#tpu.dimension_semantics<parallel>], iteration_bounds = array<i64: 8>, scalar_prefetch = 0 : i64, scratch_operands = 0 : i64, tpu.core_type = #tpu.core_type<tc>, window_params = [{transform_indices = @transform_0, window_bounds = array<i64: 1, 16, 16>}, {transform_indices = @transform_1, window_bounds = array<i64: 1, 17, 17>}]} {
    %c0 = arith.constant 0 : index
    %c0_0 = arith.constant 0 : index
    %c0_1 = arith.constant 0 : index
    %0 = vector.load %arg1[%c0, %c0_0, %c0_1] : memref<1x16x16xf32, #tpu.memory_space<vmem>>, vector<1x16x16xf32>
    %1 = vector.extract_strided_slice %0 {offsets = [0, 0, 0], sizes = [1, 1, 16], strides = [1, 1, 1]} : vector<1x16x16xf32> to vector<1x1x16xf32>
    %2 = tpu.concatenate %1, %0 in 1 : vector<1x1x16xf32>, vector<1x16x16xf32> -> vector<1x17x16xf32>
    %3 = vector.extract_strided_slice %0 {offsets = [0, 15, 0], sizes = [1, 1, 16], strides = [1, 1, 1]} : vector<1x16x16xf32> to vector<1x1x16xf32>
    %4 = tpu.concatenate %0, %3 in 1 : vector<1x16x16xf32>, vector<1x1x16xf32> -> vector<1x17x16xf32>
    %5 = arith.addf %2, %4 : vector<1x17x16xf32>
    %6 = vector.extract_strided_slice %5 {offsets = [0, 0, 0], sizes = [1, 17, 1], strides = [1, 1, 1]} : vector<1x17x16xf32> to vector<1x17x1xf32>
    %7 = tpu.concatenate %6, %5 in 2 : vector<1x17x1xf32>, vector<1x17x16xf32> -> vector<1x17x17xf32>
    %8 = vector.extract_strided_slice %5 {offsets = [0, 0, 15], sizes = [1, 17, 1], strides = [1, 1, 1]} : vector<1x17x16xf32> to vector<1x17x1xf32>
    %9 = tpu.concatenate %5, %8 in 2 : vector<1x17x16xf32>, vector<1x17x1xf32> -> vector<1x17x17xf32>
    %10 = arith.addf %7, %9 : vector<1x17x17xf32>
    %cst = arith.constant 2.500000e-01 : f32
    %11 = vector.broadcast %cst : f32 to vector<1x17x17xf32>
    %12 = arith.mulf %11, %10 : vector<1x17x17xf32>
    %c0_2 = arith.constant 0 : index
    %c0_3 = arith.constant 0 : index
    %c0_4 = arith.constant 0 : index
    %13 = vector.load %arg2[%c0_2, %c0_3, %c0_4] : memref<1x17x17xf32, #tpu.memory_space<vmem>>, vector<1x17x17xf32>
    tpu.vector_store %arg2[%c0_2, %c0_3, %c0_4], %12 {strides = array<i32>} : memref<1x17x17xf32, #tpu.memory_space<vmem>>, vector<1x17x17xf32>,
    return
  }
  func.func @transform_0(%arg0: i32) -> (i32, i32, i32) {
    %c0_i32 = arith.constant 0 : i32
    %c0_i32_0 = arith.constant 0 : i32
    %c0_i32_1 = arith.constant 0 : i32
    return %arg0, %c0_i32, %c0_i32_0 : i32, i32, i32
  }
  func.func @transform_1(%arg0: i32) -> (i32, i32, i32) {
    %c0_i32 = arith.constant 0 : i32
    %c0_i32_0 = arith.constant 0 : i32
    %c0_i32_1 = arith.constant 0 : i32
    return %arg0, %c0_i32, %c0_i32_0 : i32, i32, i32
  }
}

</mosaic_0001>

<bundles_post_ra>
// kernel: volume_to_vertex_interpolate_2d.1
= control target key start
LH: loop header
LB: loop body
LE: loop exit
PB: predicated region body
PF: predicated region fallthrough
CT: control target
= control target key end

     0   :  { %6 = vsyncpa [#allocation3], 0  ;;  %s499_s0 = inlined_call_operand.hbm [shape: f32[8,16,16], index: 0, kind: input, shape index: {}]   ;;  %s500_s1 = inlined_call_operand.vmem [shape: f32[8,17,17], index: 1, kind: output, shape index: {}]  }
   0x1   :  { %8 = vsyncpa [#allocation3 + $0x1], 0  ;;  %s385_s6 = smov 0   ;;  %s387_s7 = smov 0  }
   0x2   :  { %s389_s8 = smov 0   ;;  %s391_s9 = smov 0  }
   0x3 LB: > { %s404_s10 = sadd.s32 4294967295, %s369_s9   ;;  %s407_s11 = sadd.s32 1, %s369_s9   ;;  %s369_s9 = sphi %s391_s9, %s507_s9   ;;  %s365_s8 = sphi %s389_s8, %s506_s8   ;;  %s361_s7 = sphi %s387_s7, %s505_s7   ;;  %s357_s6 = sphi %s385_s6, %s504_s6  }
   0x4   : > { %s18_s12 = ssub.s32 %s369_s9, %s407_s11  ;;  %s21_s13 = sadd.s32 1, %s365_s8 }
   0x5   : > { %p19_p0 = scmp.eq.s32.totalorder %s18_s12, 0  ;;  %p28_p1 = scmp.ne.s32.totalorder %s365_s8, %s361_s7 }
   0x6   : > { %p29_p2 = scmp.eq.s32.totalorder %s369_s9, 0  ;;  %p34_p3 = scmp.ne.s32.totalorder %s361_s7, %s357_s6 }
   0x7   : > { %s417_s14 = scalar_select %p19_p0, %s365_s8, %s21_s13  }
   0x8   : > { %p30_p4 = por %p29_p2, %p28_p1  ;;  %p35_p5 = scmp.eq.s32.totalorder %s404_s10, 0 }
   0x9   : > { %p269_p6 = scmp.lt.s32.totalorder %s369_s9, 8  ;;  %s84_s16 = sand.u32 1, %s365_s8  }
   0xa   : > { %p421_p7 = por %p35_p5, %p34_p3  ;;  %s253_s17 = sshll.u32 %s84_s16, 4 }
   0xb   : > { %s261_s18 = sshll.u32 %s369_s9, 8  ;;  %s88_s22 = scalar_lea.vmem [#allocation2], %s253_s17 }
   0xc   : > { %s430_s21 = scalar_lea.hbm %s499_s0, %s261_s18  ;;  %s95_s23 = sshll.u32 %s88_s22, 4  ;;  %s432_s23 = int_to_ptr.vmem [resolvable:$true] %s95_s23 }
   0xd   : > { %p434_p8 = pnand %p269_p6, %p30_p4  ;;  %s439_s25 = scalar_lea.sflag [#allocation3], %s84_s16 }
   0xe   : > { %s305_s26 = scalar_lea.hbm %s430_s21, 256  ;;  %s310_s29 = scalar_lea.hbm %s499_s0, 2048 }
   0xf   : > { %p306_p10 = scmp.ne.s32.totalorder %s430_s21, %s305_s26  ;;  %p307_p11 = pneg %p434_p8 }
  0x10   : > { %p311_p0 = scmp.lt.u32.totalorder %s430_s21, %s499_s0  ;;  %p312_p1 = scmp.lt.u32.totalorder %s310_s29, %s305_s26 }
  0x11   : > { %p308_p12 = pnand %p307_p11, %p306_p10  ;;  %p314_p3 = scmp.lt.u32.totalorder %s305_s26, %s430_s21 }
  0x12   : > { %p313_p2 = por %p312_p1, %p311_p0 }
  0x13   : > { %p309_p13 = pneg %p308_p12 }
  0x14   : > { %p315_p4 = por %p314_p3, %p313_p2 }
  0x16   : > { %p316_p5 = pnand %p315_p4, %p309_p13 }
  0x18   : > { %319 = shalt.err (!%p316_p5)
}
  0x19   : > { %s320_s3 = scalar_lea.vmem %s432_s23, 256  ;;  %s371_s4 = smov [#allocation2]  }
  0x1a   : > { %p321_p6 = scmp.ne.s32.totalorder %s432_s23, %s320_s3  ;;  %s325_s5 = sshll.u32 %s371_s4, 4  ;;  %s326_s5 = int_to_ptr.vmem [resolvable:$false] %s325_s5 }
  0x1b   : > { %s327_s6 = scalar_lea.vmem %s326_s5, 512  ;;  %p328_p9 = scmp.lt.s32.totalorder %s432_s23, %s326_s5 }
  0x1c   : > { %p323_p10 = pnand %p321_p6, %p307_p11  ;;  %p329_p0 = scmp.lt.s32.totalorder %s327_s6, %s320_s3 }
  0x1e   : > { %p324_p12 = pneg %p323_p10  ;;  %p330_p1 = por %p329_p0, %p328_p9 }
  0x20   : > { %p331_p2 = pnand %p330_p1, %p324_p12 }
  0x22   : > { %334 = shalt.err (!%p331_p2)
}
  0x23   : > { %s372_s12 = smov 128   ;;  %s373_s13 = smov 8  }
  0x24   : > { %268 = dma.hbm_to_vmem [thread:$0]  (!%p434_p8), %s430_s21, 256, %s432_s23, %s439_s25, %s372_s12, %s372_s12, %s373_s13  }
  0x25   : > { %p103_p11 = scmp.lt.s32.totalorder %s369_s9, 9  ;;  %p503_p13 = scmp.ge.s32.totalorder %s369_s9, 1 }
  0x27   : > { %p104_p3 = pnand %p503_p13, %p103_p11 }
  0x28   : > { %s109_s16 = sand.u32 (!%p104_p3), 1, %s361_s7  }
  0x29   : > { %107 = sbr.rel (%p104_p3) target bundleno = 180 (0xb4), region = 24  ;;  %s257_s17 = sshll.u32 (!%p104_p3), %s109_s16, 4 }
  0x2a   : > { %s110_s18 = scalar_lea.sflag (!%p104_p3), [#allocation3], %s109_s16  ;;  %s113_s19 = scalar_lea.vmem (!%p104_p3), [#allocation2], %s257_s17 }
  0x30   : > { %352 = dma.done.wait (%p421_p7), %s110_s18, 256  }
  0x31   : > { %354 = vsyncadd (%p421_p7), %s110_s18, 4294967040  ;;  %v137_v0 = vld [vmem:[%s113_s19] sm:$0xff]  ;;  %vm141_vm0 = vcmask 1040384   ;;  %v138_v1 = vld [vmem:[%s113_s19 + $0x8] sm:$0xff]  ;;  %s374_s9 = smov 1   ;;  %p132_p8 = scmp.lt.s32.totalorder %s404_s10, 7 }
  0x32   : > { %v142_v2 = vrot.slane %v137_v0, 7  ;;  %v143_v3 = vrot.slane %v138_v1, 7  ;;  %vm164_vm1 = vcmask 7168   ;;  %vm168_vm2 = vcmask 130048  }
  0x33   : > { %s509_s10 = smov (!%p132_p8, %s404_s10), 7  ;;  %vm181_vm3 = vcmask 131072   ;;  %vm178_vm4 = vcmask 138240  }
  0x34   : > { %v148_v4 = vsel %vm141_vm0, %v137_v0, %v142_v2  ;;  %v151_v5 = vadd.f32 %v143_v3, %v143_v3  ;;  %v144_v6 = vsel %vm141_vm0, %v142_v2, %v143_v3  ;;  %s262_s15 = smul.u32 24, %s509_s10 }
  0x35   : > { %v149_v7 = vadd.f32 %v148_v4, %v137_v0  ;;  %v150_v8 = vadd.f32 %v144_v6, %v138_v1 }
  0x36   : > { %159 = vrot.lane.b32.xlu1 %v151_v5, %s374_s9  ;;  %s136_s22 = scalar_lea.vmem %s500_s1, %s262_s15 }
  0x37   : > { %155 = vrot.lane.b32.xlu0 %v149_v7, %s374_s9 }
  0x3b   : > { %157 = vrot.lane.b32.xlu0 %v150_v8, %s374_s9 }
  0xa8   : > { %v160_v9 = vpop.permute.xlu1 %159 }
  0xa9   : > { %v156_v10 = vpop.permute.xlu0 %155  ;;  %v167_v11 = vsel %vm164_vm1, %v151_v5, %v160_v9  ;;  %v171_v12 = vsel %vm168_vm2, %v151_v5, %v160_v9 }
  0xaa   : > { %v165_v13 = vsel %vm164_vm1, %v149_v7, %v156_v10  ;;  %v169_v14 = vsel %vm168_vm2, %v149_v7, %v156_v10  ;;  %v174_v15 = vadd.f32 %v171_v12, %v167_v11 }
  0xab   : > { %v172_v16 = vadd.f32 %v169_v14, %v165_v13 }
  0xac   : > { %v177_v17 = vmul.f32 0.25, %v174_v15 }
  0xad   : > { %v175_v18 = vmul.f32 0.25, %v172_v16  ;;  %v158_v19 = vpop.permute.xlu0 %157 }
  0xae   : > { %182 = vst.msk [vmem:[%s136_s22 + $0x10] sm:$0x1] %vm181_vm3, %v177_v17  ;;  %v166_v20 = vsel %vm164_vm1, %v150_v8, %v158_v19  ;;  %v170_v21 = vsel %vm168_vm2, %v150_v8, %v158_v19 }
  0xaf   : > { %179 = vst.msk [vmem:[%s136_s22] sm:$0xff] %vm178_vm4, %v175_v18  ;;  %v173_v22 = vadd.f32 %v170_v21, %v166_v20 }
  0xb1   : > { %v176_v23 = vmul.f32 0.25, %v173_v22 }
  0xb3   : > { %180 = vst.msk [vmem:[%s136_s22 + $0x8] sm:$0xff] %vm178_vm4, %v176_v23 }
  0xb4 PF: > { %p11_p7 = scmp.ge.s32.totalorder %s407_s11, 10   ;;  %s504_s6 = smov %s361_s7 }
  0xb5   : > { %s505_s7 = smov %s365_s8  ;;  %s506_s8 = smov %s417_s14 }
  0xb6   : > { %s507_s9 = smov %s407_s11  ;;  %13 = sbr.rel (!%p11_p7) target bundleno = 3 (0x3), region = 64 }
  0xbd   :  { %204 = vsyncpa [#allocation3], 1 }
  0xbe   :  { %206 = vsyncpa [#allocation3 + $0x1], 1 }

</bundles_post_ra>
